<compile_context>
chip_gen: v6e
topology: v6e:2x2x1
jax: 0.10.0
libtpu: 0.0.40
codegen_flags: <defaults>
</compile_context>

<pallas_src>
import jax
import jax.numpy as jnp
from jax.experimental import pallas as pl
from jax.experimental.pallas import tpu as pltpu


def _round_up(a, m):
    return ((a + m - 1) // m) * m


def _embed_kernel(patch_ref, w_ref, b_ref, cls_ref, pos_ref, o_ref):
    # patch_ref : (1, tn, K)   compute-dtype patch rows for this (batch, seq tile)
    #                          (row 0 of seq-tile 0 is a zero pad row)
    # w_ref     : (K, D)       resident projection weight (compute dtype)
    # b_ref     : (1, D)       resident bias (f32)
    # cls_ref   : (1, 1, D)    class token for this batch (f32)
    # pos_ref   : (1, 1, D)    positional embedding for this batch (f32)
    # o_ref     : (1, tn, D)   output tile (f32 or bf16)
    pos = pos_ref[0]                             # (1, D)
    bias_pos = b_ref[...] + pos                  # fused epilogue add, (1, D)

    proj = jnp.dot(patch_ref[0], w_ref[...],
                   preferred_element_type=jnp.float32)       # (tn, D), f32 acc

    # Single aligned, lane-dense full-tile store.
    o_ref[0, :, :] = (proj + bias_pos).astype(o_ref.dtype)

    @pl.when(pl.program_id(1) == 0)
    def _():
        # Overwrite the zero pad row with the class token (+ pos): 1-row store.
        o_ref[0, 0:1, :] = (cls_ref[0] + pos).astype(o_ref.dtype)


def _vmem_capacity_bytes():
    try:
        return int(pltpu.get_tpu_info().vmem_capacity_bytes)
    except Exception:
        return 64 << 20          # conservative fallback (v7x-sized VMEM)


def input_embedding(x, w, b, class_token, pos_embedding, patch_size,
                    *, compute_dtype=jnp.bfloat16, out_dtype=jnp.float32,
                    seq_tile=2048):
    """x: (B, C, H, W) -> (B, num_patches + 1, D) in out_dtype."""
    B, C, H, W = x.shape
    p = patch_size
    h, w_ = H // p, W // p
    n = h * w_
    in_size = p * p * C
    D = w.shape[1]

    # --- host-side patchify in '(c h1 w1)' order (p-contiguous gather runs) ---
    xc = x.astype(compute_dtype)                      # cast fuses into transpose
    patches = (xc.reshape(B, C, h, p, w_, p)
                 .transpose(0, 2, 4, 1, 3, 5)         # b h w c h1 w1
                 .reshape(B, n, in_size))
    # One-time weight-row permutation to the matching '(c h1 w1)' order.
    w_cf = (w.reshape(p, p, C, D)                     # rows were (h1, w1, c)
              .transpose(2, 0, 1, 3)
              .reshape(in_size, D)
              .astype(compute_dtype))

    # --- K padding: full 128-wide MXU K tiles / lane-aligned patch rows ---
    K = max(_round_up(in_size, 128), 128)
    if K != in_size:
        w_cf = jnp.pad(w_cf, ((0, K - in_size), (0, 0)))

    comp_isz = jnp.dtype(compute_dtype).itemsize
    out_isz = jnp.dtype(out_dtype).itemsize

    # --- choose the sequence tile tn from the per-generation VMEM budget ---
    ALIGN = 16                        # unmasked sublane stores, incl. bf16 out
    seq = n + 1                       # +1 class-token row
    seq_r = _round_up(seq, ALIGN)
    vmem_cap = int(_vmem_capacity_bytes() * 0.8)      # leave compiler headroom
    resident = 2 * K * D * comp_isz + 2 * 3 * D * 4   # weight + bias/cls/pos
    per_row = 2 * (K * comp_isz + D * out_isz)        # double-buffered in + out
    budget_rows = max((vmem_cap - resident - (4 << 20)) // per_row, ALIGN)
    budget_rows = (budget_rows // ALIGN) * ALIGN
    tn = max(min(seq_r, _round_up(seq_tile, ALIGN), budget_rows), ALIGN)
    T = -(-seq // tn)
    if B * T < 2 and seq_r > ALIGN:   # keep both v7x TensorCores busy
        tn = _round_up(-(-seq // 2), ALIGN)
        T = -(-seq // tn)
    S = T * tn

    # Leading zero row (class-token slot) + tail pad + K pad in one jnp.pad.
    patches = jnp.pad(patches, ((0, 0), (1, S - seq), (0, K - in_size)))

    b2d = b.reshape(1, D).astype(jnp.float32)
    cls = class_token.astype(jnp.float32)
    pos = pos_embedding.astype(jnp.float32)

    def run(single_buffer_residents):
        res_kw = ({"pipeline_mode": pl.Buffered(1)}
                  if single_buffer_residents else {})
        grid_spec = pltpu.PrefetchScalarGridSpec(
            num_scalar_prefetch=0,
            grid=(B, T),
            in_specs=[
                pl.BlockSpec((1, tn, K), lambda bi, ti: (bi, ti, 0)),
                pl.BlockSpec((K, D), lambda bi, ti: (0, 0), **res_kw),
                pl.BlockSpec((1, D), lambda bi, ti: (0, 0), **res_kw),
                pl.BlockSpec((1, 1, D), lambda bi, ti: (bi, 0, 0)),
                pl.BlockSpec((1, 1, D), lambda bi, ti: (bi, 0, 0)),
            ],
            out_specs=pl.BlockSpec((1, tn, D), lambda bi, ti: (bi, ti, 0)),
        )
        return pl.pallas_call(
            _embed_kernel,
            out_shape=jax.ShapeDtypeStruct((B, S, D), out_dtype),
            grid_spec=grid_spec,
            compiler_params=pltpu.CompilerParams(
                dimension_semantics=("parallel", "parallel"),
                vmem_limit_bytes=vmem_cap,
            ),
        )(patches, w_cf, b2d, cls, pos)

    try:
        out = run(True)        # single-buffer the constant-index residents
    except Exception:
        out = run(False)       # older JAX: fall back to default buffering

    if S != seq:
        out = out[:, :seq, :]  # fuses into the consumer in a larger program
    return out


if __name__ == "__main__":
    # Small, forward-consistent shapes (lane-dense D).
    batch = 2
    n_channels = 3
    patch_size_ = 4
    img = 16                    # 16x16 image -> (16/4)^2 = 16 patches
    latent = 128
    in_size = patch_size_ * patch_size_ * n_channels   # 48 -> K padded to 128

    key = jax.random.PRNGKey(0)
    kx, kw, kb, kc, kp = jax.random.split(key, 5)

    x = jax.random.normal(kx, (batch, n_channels, img, img), dtype=jnp.float32)
    # nn.Linear(in_size, latent): (in_size, latent) = torch weight.T, rows in
    # the reference '(h1 w1 c)' feature order.
    w = jax.random.normal(kw, (in_size, latent), dtype=jnp.float32) / jnp.sqrt(in_size)
    b = jax.random.normal(kb, (latent,), dtype=jnp.float32) / jnp.sqrt(in_size)
    class_token = jax.random.normal(kc, (batch, 1, latent), dtype=jnp.float32)
    pos_embedding = jax.random.normal(kp, (batch, 1, latent), dtype=jnp.float32)

    # Pure-JAX references ('(h1 w1 c)' feature order, like the PyTorch module).
    p = patch_size_
    hh = ww = img // p
    patches_hwc = (x.reshape(batch, n_channels, hh, p, ww, p)
                     .transpose(0, 2, 4, 3, 5, 1)
                     .reshape(batch, hh * ww, in_size))
    proj_bf16 = jnp.dot(patches_hwc.astype(jnp.bfloat16), w.astype(jnp.bfloat16),
                        preferred_element_type=jnp.float32) + b
    ref_bf16 = jnp.concatenate([class_token, proj_bf16], axis=1) + pos_embedding
    proj_f32 = jnp.dot(patches_hwc, w, preferred_element_type=jnp.float32) + b
    ref_f32 = jnp.concatenate([class_token, proj_f32], axis=1) + pos_embedding

    # Single-tile path (T == 1 after padding).
    out = jax.block_until_ready(
        input_embedding(x, w, b, class_token, pos_embedding, patch_size_))
    # Tiled-sequence path (T > 1).
    out_tiled = jax.block_until_ready(
        input_embedding(x, w, b, class_token, pos_embedding, patch_size_,
                        seq_tile=16))
    # bf16-output path (mem-bound generations).
    out_bf16 = jax.block_until_ready(
        input_embedding(x, w, b, class_token, pos_embedding, patch_size_,
                        out_dtype=jnp.bfloat16))
    # batch=1 path (forces T >= 2 so both v7x TensorCores get work).
    out_b1 = jax.block_until_ready(
        input_embedding(x[:1], w, b, class_token[:1], pos_embedding[:1],
                        patch_size_))

    seq = hh * ww + 1
    assert out.shape == (batch, seq, latent)
    assert out_tiled.shape == (batch, seq, latent)
    assert out_bf16.shape == (batch, seq, latent) and out_bf16.dtype == jnp.bfloat16
    assert out_b1.shape == (1, seq, latent)

    assert jnp.allclose(out, ref_bf16, atol=2e-3, rtol=2e-3)
    assert jnp.allclose(out_tiled, ref_bf16, atol=2e-3, rtol=2e-3)
    assert jnp.allclose(out_b1, ref_bf16[:1], atol=2e-3, rtol=2e-3)
    assert jnp.allclose(out_bf16.astype(jnp.float32), ref_bf16, atol=2e-2, rtol=2e-2)
    # Documented tolerance vs the exact f32 PyTorch forward (bf16 matmul inputs).
    assert jnp.allclose(out, ref_f32, atol=3e-2, rtol=3e-2)
    print("KERNEL_OK")
</pallas_src>

<mosaic_0001>
module attributes {stable_mosaic.version = 11 : i64} {
  func.func @_embed_kernel(%arg0: i32, %arg1: i32, %arg2: memref<1x32x128xbf16, #tpu.memory_space<vmem>>, %arg3: memref<128x128xbf16, #tpu.memory_space<vmem>>, %arg4: memref<1x128xf32, #tpu.memory_space<vmem>>, %arg5: memref<1x1x128xf32, #tpu.memory_space<vmem>>, %arg6: memref<1x1x128xf32, #tpu.memory_space<vmem>>, %arg7: memref<1x32x128xf32, #tpu.memory_space<vmem>>) attributes {dimension_semantics = [#tpu.dimension_semantics<parallel>, #tpu.dimension_semantics<parallel>], iteration_bounds = array<i64: 2, 1>, scalar_prefetch = 0 : i64, scratch_operands = 0 : i64, tpu.core_type = #tpu.core_type<tc>, window_params = [{transform_indices = @transform_0, window_bounds = array<i64: 1, 32, 128>}, {pipeline_mode = #tpu.pipeline_mode<synchronous>, transform_indices = @transform_1, window_bounds = array<i64: 128, 128>}, {pipeline_mode = #tpu.pipeline_mode<synchronous>, transform_indices = @transform_2, window_bounds = array<i64: 1, 128>}, {transform_indices = @transform_3, window_bounds = array<i64: 1, 1, 128>}, {transform_indices = @transform_4, window_bounds = array<i64: 1, 1, 128>}, {transform_indices = @transform_5, window_bounds = array<i64: 1, 32, 128>}]} {
    %c0 = arith.constant 0 : index
    %c0_0 = arith.constant 0 : index
    %c0_1 = arith.constant 0 : index
    %0 = vector.load %arg6[%c0, %c0_0, %c0_1] : memref<1x1x128xf32, #tpu.memory_space<vmem>>, vector<1x1x128xf32>
    %1 = vector.shape_cast %0 : vector<1x1x128xf32> to vector<1x128xf32>
    %c0_2 = arith.constant 0 : index
    %c0_3 = arith.constant 0 : index
    %2 = vector.load %arg4[%c0_2, %c0_3] : memref<1x128xf32, #tpu.memory_space<vmem>>, vector<1x128xf32>
    %3 = arith.addf %2, %1 : vector<1x128xf32>
    %c0_4 = arith.constant 0 : index
    %c0_5 = arith.constant 0 : index
    %c0_6 = arith.constant 0 : index
    %4 = vector.load %arg2[%c0_4, %c0_5, %c0_6] : memref<1x32x128xbf16, #tpu.memory_space<vmem>>, vector<1x32x128xbf16>
    %5 = vector.shape_cast %4 : vector<1x32x128xbf16> to vector<32x128xbf16>
    %c0_7 = arith.constant 0 : index
    %c0_8 = arith.constant 0 : index
    %6 = vector.load %arg3[%c0_7, %c0_8] : memref<128x128xbf16, #tpu.memory_space<vmem>>, vector<128x128xbf16>
    %cst = arith.constant dense<0.000000e+00> : vector<32x128xf32>
    %7 = tpu.matmul %5, %6, %cst {dimension_numbers = #tpu.dot_dimension_numbers<[1], [0], [0], [1], [0, 0, 1, 1], [], []>} : vector<32x128xbf16>, vector<128x128xbf16>, vector<32x128xf32> -> vector<32x128xf32>
    %8 = vector.broadcast %3 : vector<1x128xf32> to vector<32x128xf32>
    %9 = arith.addf %7, %8 : vector<32x128xf32>
    %c0_9 = arith.constant 0 : index
    %c0_10 = arith.constant 0 : index
    %c0_11 = arith.constant 0 : index
    %10 = vector.load %arg7[%c0_9, %c0_10, %c0_11] : memref<1x32x128xf32, #tpu.memory_space<vmem>>, vector<1x32x128xf32>
    %11 = vector.shape_cast %10 : vector<1x32x128xf32> to vector<32x128xf32>
    %12 = vector.shape_cast %9 : vector<32x128xf32> to vector<1x32x128xf32>
    tpu.vector_store %arg7[%c0_9, %c0_10, %c0_11], %12 {strides = array<i32>} : memref<1x32x128xf32, #tpu.memory_space<vmem>>, vector<1x32x128xf32>,
    %c0_i32 = arith.constant 0 : i32
    %13 = arith.cmpi eq, %arg1, %c0_i32 : i32
    %14 = arith.extui %13 : i1 to i32
    %c0_i32_12 = arith.constant 0 : i32
    %15 = arith.cmpi ne, %14, %c0_i32_12 : i32
    scf.if %15 {
      %c0_13 = arith.constant 0 : index
      %c0_14 = arith.constant 0 : index
      %c0_15 = arith.constant 0 : index
      %16 = vector.load %arg5[%c0_13, %c0_14, %c0_15] : memref<1x1x128xf32, #tpu.memory_space<vmem>>, vector<1x1x128xf32>
      %17 = vector.shape_cast %16 : vector<1x1x128xf32> to vector<1x128xf32>
      %18 = arith.addf %17, %1 : vector<1x128xf32>
      %c0_16 = arith.constant 0 : index
      %c0_17 = arith.constant 0 : index
      %c0_18 = arith.constant 0 : index
      %19 = vector.load %arg7[%c0_16, %c0_17, %c0_18] : memref<1x32x128xf32, #tpu.memory_space<vmem>>, vector<1x1x128xf32>
      %20 = vector.shape_cast %19 : vector<1x1x128xf32> to vector<1x128xf32>
      %21 = vector.shape_cast %18 : vector<1x128xf32> to vector<1x1x128xf32>
      tpu.vector_store %arg7[%c0_16, %c0_17, %c0_18], %21 {strides = array<i32>} : memref<1x32x128xf32, #tpu.memory_space<vmem>>, vector<1x1x128xf32>,
    } else {
    }
    return
  }
  func.func @transform_0(%arg0: i32, %arg1: i32) -> (i32, i32, i32) {
    %c0_i32 = arith.constant 0 : i32
    %c0_i32_0 = arith.constant 0 : i32
    return %arg0, %arg1, %c0_i32 : i32, i32, i32
  }
  func.func @transform_1(%arg0: i32, %arg1: i32) -> (i32, i32) {
    %c0_i32 = arith.constant 0 : i32
    %c0_i32_0 = arith.constant 0 : i32
    %c0_i32_1 = arith.constant 0 : i32
    return %c0_i32, %c0_i32_0 : i32, i32
  }
  func.func @transform_2(%arg0: i32, %arg1: i32) -> (i32, i32) {
    %c0_i32 = arith.constant 0 : i32
    %c0_i32_0 = arith.constant 0 : i32
    %c0_i32_1 = arith.constant 0 : i32
    return %c0_i32, %c0_i32_0 : i32, i32
  }
  func.func @transform_3(%arg0: i32, %arg1: i32) -> (i32, i32, i32) {
    %c0_i32 = arith.constant 0 : i32
    %c0_i32_0 = arith.constant 0 : i32
    %c0_i32_1 = arith.constant 0 : i32
    return %arg0, %c0_i32, %c0_i32_0 : i32, i32, i32
  }
  func.func @transform_4(%arg0: i32, %arg1: i32) -> (i32, i32, i32) {
    %c0_i32 = arith.constant 0 : i32
    %c0_i32_0 = arith.constant 0 : i32
    %c0_i32_1 = arith.constant 0 : i32
    return %arg0, %c0_i32, %c0_i32_0 : i32, i32, i32
  }
  func.func @transform_5(%arg0: i32, %arg1: i32) -> (i32, i32, i32) {
    %c0_i32 = arith.constant 0 : i32
    %c0_i32_0 = arith.constant 0 : i32
    return %arg0, %arg1, %c0_i32 : i32, i32, i32
  }
}

module attributes {stable_mosaic.version = 11 : i64} {
  func.func @_embed_kernel(%arg0: i32, %arg1: i32, %arg2: memref<1x32x128xbf16, #tpu.memory_space<vmem>>, %arg3: memref<128x128xbf16, #tpu.memory_space<vmem>>, %arg4: memref<1x128xf32, #tpu.memory_space<vmem>>, %arg5: memref<1x1x128xf32, #tpu.memory_space<vmem>>, %arg6: memref<1x1x128xf32, #tpu.memory_space<vmem>>, %arg7: memref<1x32x128xf32, #tpu.memory_space<vmem>>) attributes {dimension_semantics = [#tpu.dimension_semantics<parallel>, #tpu.dimension_semantics<parallel>], iteration_bounds = array<i64: 2, 1>, scalar_prefetch = 0 : i64, scratch_operands = 0 : i64, tpu.core_type = #tpu.core_type<tc>, window_params = [{transform_indices = @transform_0, window_bounds = array<i64: 1, 32, 128>}, {pipeline_mode = #tpu.pipeline_mode<synchronous>, transform_indices = @transform_1, window_bounds = array<i64: 128, 128>}, {pipeline_mode = #tpu.pipeline_mode<synchronous>, transform_indices = @transform_2, window_bounds = array<i64: 1, 128>}, {transform_indices = @transform_3, window_bounds = array<i64: 1, 1, 128>}, {transform_indices = @transform_4, window_bounds = array<i64: 1, 1, 128>}, {transform_indices = @transform_5, window_bounds = array<i64: 1, 32, 128>}]} {
    %c0 = arith.constant 0 : index
    %c0_0 = arith.constant 0 : index
    %c0_1 = arith.constant 0 : index
    %0 = vector.load %arg6[%c0, %c0_0, %c0_1] : memref<1x1x128xf32, #tpu.memory_space<vmem>>, vector<1x1x128xf32>
    %1 = vector.shape_cast %0 : vector<1x1x128xf32> to vector<1x128xf32>
    %c0_2 = arith.constant 0 : index
    %c0_3 = arith.constant 0 : index
    %2 = vector.load %arg4[%c0_2, %c0_3] : memref<1x128xf32, #tpu.memory_space<vmem>>, vector<1x128xf32>
    %3 = arith.addf %2, %1 : vector<1x128xf32>
    %c0_4 = arith.constant 0 : index
    %c0_5 = arith.constant 0 : index
    %c0_6 = arith.constant 0 : index
    %4 = vector.load %arg2[%c0_4, %c0_5, %c0_6] : memref<1x32x128xbf16, #tpu.memory_space<vmem>>, vector<1x32x128xbf16>
    %5 = vector.shape_cast %4 : vector<1x32x128xbf16> to vector<32x128xbf16>
    %c0_7 = arith.constant 0 : index
    %c0_8 = arith.constant 0 : index
    %6 = vector.load %arg3[%c0_7, %c0_8] : memref<128x128xbf16, #tpu.memory_space<vmem>>, vector<128x128xbf16>
    %cst = arith.constant dense<0.000000e+00> : vector<32x128xf32>
    %7 = tpu.matmul %5, %6, %cst {dimension_numbers = #tpu.dot_dimension_numbers<[1], [0], [0], [1], [0, 0, 1, 1], [], []>} : vector<32x128xbf16>, vector<128x128xbf16>, vector<32x128xf32> -> vector<32x128xf32>
    %8 = vector.broadcast %3 : vector<1x128xf32> to vector<32x128xf32>
    %9 = arith.addf %7, %8 : vector<32x128xf32>
    %c0_9 = arith.constant 0 : index
    %c0_10 = arith.constant 0 : index
    %c0_11 = arith.constant 0 : index
    %10 = vector.load %arg7[%c0_9, %c0_10, %c0_11] : memref<1x32x128xf32, #tpu.memory_space<vmem>>, vector<1x32x128xf32>
    %11 = vector.shape_cast %10 : vector<1x32x128xf32> to vector<32x128xf32>
    %12 = vector.shape_cast %9 : vector<32x128xf32> to vector<1x32x128xf32>
    tpu.vector_store %arg7[%c0_9, %c0_10, %c0_11], %12 {strides = array<i32>} : memref<1x32x128xf32, #tpu.memory_space<vmem>>, vector<1x32x128xf32>,
    %c0_i32 = arith.constant 0 : i32
    %13 = arith.cmpi eq, %arg1, %c0_i32 : i32
    %14 = arith.extui %13 : i1 to i32
    %c0_i32_12 = arith.constant 0 : i32
    %15 = arith.cmpi ne, %14, %c0_i32_12 : i32
    scf.if %15 {
      %c0_13 = arith.constant 0 : index
      %c0_14 = arith.constant 0 : index
      %c0_15 = arith.constant 0 : index
      %16 = vector.load %arg5[%c0_13, %c0_14, %c0_15] : memref<1x1x128xf32, #tpu.memory_space<vmem>>, vector<1x1x128xf32>
      %17 = vector.shape_cast %16 : vector<1x1x128xf32> to vector<1x128xf32>
      %18 = arith.addf %17, %1 : vector<1x128xf32>
      %c0_16 = arith.constant 0 : index
      %c0_17 = arith.constant 0 : index
      %c0_18 = arith.constant 0 : index
      %19 = vector.load %arg7[%c0_16, %c0_17, %c0_18] : memref<1x32x128xf32, #tpu.memory_space<vmem>>, vector<1x1x128xf32>
      %20 = vector.shape_cast %19 : vector<1x1x128xf32> to vector<1x128xf32>
      %21 = vector.shape_cast %18 : vector<1x128xf32> to vector<1x1x128xf32>
      tpu.vector_store %arg7[%c0_16, %c0_17, %c0_18], %21 {strides = array<i32>} : memref<1x32x128xf32, #tpu.memory_space<vmem>>, vector<1x1x128xf32>,
    } else {
    }
    return
  }
  func.func @transform_0(%arg0: i32, %arg1: i32) -> (i32, i32, i32) {
    %c0_i32 = arith.constant 0 : i32
    %c0_i32_0 = arith.constant 0 : i32
    return %arg0, %arg1, %c0_i32 : i32, i32, i32
  }
  func.func @transform_1(%arg0: i32, %arg1: i32) -> (i32, i32) {
    %c0_i32 = arith.constant 0 : i32
    %c0_i32_0 = arith.constant 0 : i32
    %c0_i32_1 = arith.constant 0 : i32
    return %c0_i32, %c0_i32_0 : i32, i32
  }
  func.func @transform_2(%arg0: i32, %arg1: i32) -> (i32, i32) {
    %c0_i32 = arith.constant 0 : i32
    %c0_i32_0 = arith.constant 0 : i32
    %c0_i32_1 = arith.constant 0 : i32
    return %c0_i32, %c0_i32_0 : i32, i32
  }
  func.func @transform_3(%arg0: i32, %arg1: i32) -> (i32, i32, i32) {
    %c0_i32 = arith.constant 0 : i32
    %c0_i32_0 = arith.constant 0 : i32
    %c0_i32_1 = arith.constant 0 : i32
    return %arg0, %c0_i32, %c0_i32_0 : i32, i32, i32
  }
  func.func @transform_4(%arg0: i32, %arg1: i32) -> (i32, i32, i32) {
    %c0_i32 = arith.constant 0 : i32
    %c0_i32_0 = arith.constant 0 : i32
    %c0_i32_1 = arith.constant 0 : i32
    return %arg0, %c0_i32, %c0_i32_0 : i32, i32, i32
  }
  func.func @transform_5(%arg0: i32, %arg1: i32) -> (i32, i32, i32) {
    %c0_i32 = arith.constant 0 : i32
    %c0_i32_0 = arith.constant 0 : i32
    return %arg0, %arg1, %c0_i32 : i32, i32, i32
  }
}

</mosaic_0001>

<bundles_post_ra>
// kernel: tpu_custom_call.1
= control target key start
LH: loop header
LB: loop body
LE: loop exit
PB: predicated region body
PF: predicated region fallthrough
CT: control target
= control target key end

     0   :  { %s1109_s0 = inlined_call_operand.hbm [shape: bf16[2,32,128], index: 0, kind: input, shape index: {}]   ;;  %s1110_s1 = inlined_call_operand.hbm [shape: bf16[128,128], index: 1, kind: input, shape index: {}]   ;;  %s1111_s2 = inlined_call_operand.vmem [shape: f32[1,128], index: 2, kind: input, shape index: {}]   ;;  %s1112_s3 = inlined_call_operand.vmem [shape: f32[2,1,128], index: 3, kind: input, shape index: {}]   ;;  %s1113_s4 = inlined_call_operand.vmem [shape: f32[2,1,128], index: 4, kind: input, shape index: {}]   ;;  %s1114_s5 = inlined_call_operand.hbm [shape: f32[2,32,128], index: 5, kind: output, shape index: {}]  }
   0x1   :  { %1119 = sst [smem:[#allocation12_spill]] %s1110_s1 }
   0x2   :  { %10 = vsyncpa [#allocation3], 0 }
   0x3   :  { %12 = vsyncpa [#allocation3 + $0x1], 0 }
   0x4   :  { %13 = vsyncpa [#allocation6], 0 }
   0x5   :  { %14 = vsyncpa [#allocation4], 0 }
   0x6   :  { %16 = vsyncpa [#allocation4 + $0x1], 0  ;;  %s910_s18 = smov 0   ;;  %s912_s19 = smov 0  }
   0x7   :  { %s914_s20 = smov 0   ;;  %s916_s21 = smov 0  }
   0x8   :  { %s918_s22 = smov 0   ;;  %s920_s23 = smov 0  }
   0x9 LB: > { %s587_s24 = sadd.s32 4294967295, %s871_s23   ;;  %s588_s25 = sadd.s32 4294967294, %s871_s23   ;;  %s871_s23 = sphi %s920_s23, %s22_s23   ;;  %s867_s22 = sphi %s918_s22, %s1141_s22   ;;  %s863_s21 = sphi %s916_s21, %s1140_s21   ;;  %s859_s20 = sphi %s914_s20, %s1139_s20   ;;  %s855_s19 = sphi %s912_s19, %s1138_s19   ;;  %s851_s18 = sphi %s910_s18, %s1137_s18  }
   0xa   : > { %p56_p0 = scmp.ne.s32.totalorder %s855_s19, %s851_s18  ;;  %p944_p1 = scmp.eq.s32.totalorder %s587_s24, 0 }
   0xb   : > { %p948_p2 = scmp.eq.s32.totalorder %s587_s24, 1  ;;  %p182_p3 = scmp.eq.s32.totalorder %s588_s25, 1 }
   0xc   : > { %p954_p4 = por %p944_p1, %p56_p0  ;;  %p589_p5 = scmp.ge.s32.totalorder %s871_s23, 1 }
   0xd   : > { %p959_p6 = por %p182_p3, %p56_p0  ;;  %p189_p7 = scmp.lt.s32.totalorder %s871_s23, 3 }
   0xe   : > { %s1122_s28 = scalar_select %p954_p4, 1, 0 }
   0xf   : > { %s1123_s29 = scalar_select %p959_p6, 1, 0 }
  0x10   : > { %p964_p8 = pnand %p589_p5, %p189_p7  ;;  %s873_s6 = smov [#allocation5]  }
  0x11   : > { %s201_s7 = sshll.u32 %s873_s6, 4  ;;  %s34_s9 = sadd.s32 1, %s867_s22  ;;  %s202_s7 = int_to_ptr.vmem [resolvable:$true] %s201_s7 }
  0x12   : > { %p654_p9 = pneg %p964_p8  ;;  %s744_s10 = scalar_lea.vmem %s202_s7, 1024 }
  0x13   : > { %p745_p13 = scmp.ne.s32.totalorder %s202_s7, %s744_s10  ;;  %p752_p5 = scmp.lt.s32.totalorder %s202_s7, %s202_s7 }
  0x14   : > { %p973_p11 = pnand %p654_p9, %p944_p1  ;;  %p753_p7 = scmp.lt.s32.totalorder %s744_s10, %s744_s10 }
  0x16   : > { %p735_p12 = pneg %p973_p11  ;;  %p754_p6 = por %p753_p7, %p752_p5 }
  0x18   : > { %p747_p0 = pnand %p745_p13, %p735_p12 }
  0x1a   : > { %p748_p3 = pneg %p747_p0 }
  0x1c   : > { %p755_p4 = pnand %p754_p6, %p748_p3 }
  0x1e   : > { %758 = shalt.err (!%p755_p4)
}
  0x1f   : > { %s1116_s11 = smov 64   ;;  %s1117_s12 = smov 4  }
  0x20   : > { %s1126_s1 = sld [smem:[#allocation12_spill]]  ;;  %p36_p4 = scmp.ge.s32.totalorder %s34_s9, 2 }
  0x21   : > { %s43_s15 = sadd.s32 1, %s859_s20  ;;  %p50_p6 = scmp.ne.s32.totalorder %s859_s20, %s855_s19 }
  0x22   : > { %p51_p9 = scmp.eq.s32.totalorder %s871_s23, 0  ;;  %s1143_s9 = smov (%p36_p4, %s34_s9), 0 }
  0x23   : > { %1127 = sst [smem:[#allocation11_spill]] %s1143_s9  ;;  %p1000_p13 = por %p948_p2, %p50_p6 }
  0x24   : > { %p994_p12 = por %p51_p9, %p50_p6  ;;  %s38_s24 = ssub.s32 %s867_s22, %s1143_s9 }
  0x25   : > { %p667_p0 = scmp.lt.s32.totalorder %s871_s23, 2  ;;  %s218_s25 = sand.u32 1, %s859_s20  }
  0x26   : > { %657 = dma.hbm_to_vmem [thread:$0]  (!%p973_p11), %s1126_s1, 1024, %s202_s7, [#allocation6], %s1116_s11, %s1116_s11, %s1117_s12  }
  0x27   : > { %p41_p11 = scmp.eq.s32.totalorder %s38_s24, 0  ;;  %s592_s6 = sshll.u32 %s218_s25, 4 }
  0x28   : > { %s614_s8 = sshll.u32 %s867_s22, 8  ;;  %s222_s11 = scalar_lea.vmem [#allocation2], %s592_s6 }
  0x29   : > { %s1009_s7 = scalar_select %p41_p11, %s859_s20, %s43_s15  }
  0x2a   : > { %s230_s14 = scalar_lea.hbm %s1109_s0, %s614_s8  ;;  %s231_s12 = sshll.u32 %s222_s11, 4  ;;  %s232_s12 = int_to_ptr.vmem [resolvable:$true] %s231_s12 }
  0x2b   : > { %p1017_p2 = pnand %p667_p0, %p994_p12  ;;  %s219_s1 = scalar_lea.sflag [#allocation3], %s218_s25 }
  0x2c   : > { %s772_s24 = scalar_lea.vmem %s232_s12, 256  ;;  %s876_s15 = smov [#allocation2]  }
  0x2d   : > { %p761_p3 = pneg %p1017_p2  ;;  %p773_p5 = scmp.ne.s32.totalorder %s232_s12, %s772_s24 }
  0x2e   : > { %s777_s9 = sshll.u32 %s876_s15, 4  ;;  %s778_s9 = int_to_ptr.vmem [resolvable:$false] %s777_s9 }
  0x2f   : > { %p775_p7 = pnand %p773_p5, %p761_p3  ;;  %s779_s8 = scalar_lea.vmem %s778_s9, 512 }
  0x30   : > { %p780_p6 = scmp.lt.s32.totalorder %s232_s12, %s778_s9  ;;  %p781_p9 = scmp.lt.s32.totalorder %s779_s8, %s772_s24 }
  0x31   : > { %p776_p4 = pneg %p775_p7 }
  0x32   : > { %p782_p11 = por %p781_p9, %p780_p6 }
  0x34   : > { %p783_p10 = pnand %p782_p11, %p776_p4 }
  0x36   : > { %786 = shalt.err (!%p783_p10)
}
  0x37   : > { %s1131_s11 = smov 4   ;;  %s1132_s16 = smov 64  }
  0x38   : > { %661 = dma.hbm_to_vmem [thread:$0]  (!%p1017_p2), %s230_s14, 256, %s232_s12, %s219_s1, %s1132_s16, %s1132_s16, %s1131_s11  }
  0x39   : > { %255 = sbr.rel (%p964_p8) target bundleno = 313 (0x139), region = 40  ;;  %s1031_s25 = sand.u32 (!%p964_p8), 1, %s855_s19  }
  0x3a   : > { %s596_s9 = sshll.u32 (!%p964_p8), %s1031_s25, 4  ;;  %s258_s6 = scalar_lea.sflag (!%p964_p8), [#allocation3], %s1031_s25 }
  0x3b   : > { %s261_s10 = scalar_lea.vmem (!%p964_p8), [#allocation2], %s596_s9  ;;  %p1133_p12 = scmp.ne.s32.totalorder (!%p964_p8), %s1122_s28, 0 }
  0x3e   : > { %838 = dma.done.wait (%p1133_p12), %s258_s6, 256  }
  0x3f   : > { %840 = vsyncadd (%p1133_p12), %s258_s6, 4294967040 }
  0x40   : > { %842 = dma.done.wait (%p944_p1), [#allocation6], 1024  }
  0x41   : > { %844 = vsyncadd (%p944_p1), [#allocation6], 4294966272  ;;  %v723_v0 = vld [vmem:[#allocation5 + $0x38] sm:$0xff]   ;;  %v724_v1 = vld [vmem:[#allocation5 + $0x30] sm:$0xff]   ;;  %p299_p1 = scmp.lt.s32.totalorder %s863_s21, 1  ;;  %v331_v10 = vlaneseq  ;;  %s598_s15 = sshll.u32 %s1031_s25, 5 }
  0x42   : > { %626 = vmatprep.subr.bf16.mxu0 %v723_v0  ;;  %v725_v2 = vld [vmem:[#allocation5 + $0x28] sm:$0xff]   ;;  %v726_v3 = vld [vmem:[#allocation5 + $0x20] sm:$0xff]   ;;  %v727_v5 = vld [vmem:[#allocation5 + $0x18] sm:$0xff]   ;;  %s297_s8 = scalar_lea.vmem [#allocation7], %s598_s15  ;;  %s615_s16 = sshll.u32 %s863_s21, 9 }
  0x43   : > { %627 = vmatpush3.bf16.msra.mxu0 %v723_v0  ;;  %v731_v4 = vld [vmem:[%s261_s10] sm:$0xff]   ;;  %v729_v7 = vld [vmem:[#allocation5 + $0x8] sm:$0xff]   ;;  %s300_s1 = scalar_select %p299_p1, %s863_s21, 1  ;;  %v332_v11 = vshrl.u32 %v331_v10, 7 }
  0x44   : > { %628 = vmatprep.subr.bf16.mxu0 %v724_v1  ;;  %642 = vmatprep.mubr.bf16.mxu0 %v731_v4  ;;  %v728_v6 = vld [vmem:[#allocation5 + $0x10] sm:$0xff]   ;;  %v730_v8 = vld [vmem:[#allocation5] sm:$0xff]   ;;  %v732_v9 = vld [vmem:[%s261_s10 + $0x8] sm:$0xff]   ;;  %s472_s11 = sshll.u32 %s297_s8, 4  ;;  %s1061_s10 = scalar_lea.hbm %s1114_s5, %s615_s16  ;;  %s1056_s11 = int_to_ptr.vmem [resolvable:$true] %s472_s11 }
  0x45   : > { %s304_s30 = scalar_lea.vmem %s1113_s4, %s300_s1  ;;  %v308_v13 = vld [vmem:[%s1111_s2] sm:$0x1]  ;;  %v333_v15 = vsub.s32 0, %v332_v11  ;;  %s301_s24 = scalar_lea.vmem %s1112_s3, %s300_s1 }
  0x46   : > { %v307_v12 = vld [vmem:[%s304_s30] sm:$0x1]  ;;  %s457_s1 = scalar_lea.sflag [#allocation4], %s1031_s25  ;;  %s787_s21 = scalar_lea.vmem %s1056_s11, 512 }
  0x47   : > { %629 = vmatpush3.bf16.msra.mxu0 %v724_v1  ;;  %v309_v14 = vadd.f32 %v308_v13, %v307_v12  ;;  %v453_v17 = vld [vmem:[%s301_s24] sm:$0x1]  ;;  %p788_p8 = scmp.ne.s32.totalorder %s1056_s11, %s787_s21  ;;  %s877_s26 = smov [#allocation7]  }
  0x48   : > { %630 = vmatprep.subr.bf16.mxu0 %v725_v2  ;;  %v454_v20 = vadd.f32 %v453_v17, %v307_v12  ;;  %s791_s28 = sshll.u32 %s877_s26, 4  ;;  %s792_s28 = int_to_ptr.vmem [resolvable:$false] %s791_s28 }
  0x49   : > { %v334_v16 = vrot.slane %v309_v14, %v333_v15  ;;  %p789_p10 = pnand %p788_p8, %p1000_p13  ;;  %s793_s30 = scalar_lea.vmem %s792_s28, 1024 }
  0x4a   : > { %p794_p2 = scmp.lt.s32.totalorder %s1056_s11, %s792_s28  ;;  %p795_p3 = scmp.lt.s32.totalorder %s793_s30, %s787_s21 }
  0x4b   : > { %631 = vmatpush3.bf16.msra.mxu0 %v725_v2  ;;  %p790_p0 = pneg %p789_p10 }
  0x4c   : > { %632 = vmatprep.subr.bf16.mxu0 %v726_v3  ;;  %p796_p5 = por %p795_p3, %p794_p2 }
  0x4e   : > { %p797_p7 = pnand %p796_p5, %p790_p0 }
  0x4f   : > { %633 = vmatpush3.bf16.msra.mxu0 %v726_v3 }
  0x50   : > { %634 = vmatprep.subr.bf16.mxu0 %v727_v5 }
  0x53   : > { %635 = vmatpush3.bf16.msra.mxu0 %v727_v5 }
  0x54   : > { %636 = vmatprep.subr.bf16.mxu0 %v728_v6 }
  0x57   : > { %637 = vmatpush3.bf16.msra.mxu0 %v728_v6 }
  0x58   : > { %638 = vmatprep.subr.bf16.mxu0 %v729_v7 }
  0x5b   : > { %639 = vmatpush3.bf16.msra.mxu0 %v729_v7 }
  0x5c   : > { %640 = vmatprep.subr.bf16.mxu0 %v730_v8 }
  0x5f   : > { %641 = vmatpush3.bf16.msra.mxu0 %v730_v8 }
  0x62   : > { %643 = vmatmul.mubr.bf16.vlgmr.msra.gmra.mxu0 %v732_v9 }
 0x122   : > { %v644_v18 = vpop.f32.mrf.mxu0 }
 0x123   : > { %v439_v19 = vadd.f32 %v644_v18, %v334_v16 }
 0x124   : > { %v430_v21 = vpop.f32.mrf.mxu0 }
 0x125   : > { %447 = vst [vmem:[%s297_s8 + $0x10] sm:$0xff] %v439_v19  ;;  %v431_v22 = vadd.f32 %v430_v21, %v334_v16 }
 0x126   : > { %v645_v23 = vpop.f32.mrf.mxu0 }
 0x127   : > { %445 = vst [vmem:[%s297_s8] sm:$0xff] %v431_v22  ;;  %v442_v24 = vadd.f32 %v645_v23, %v334_v16 }
 0x128   : > { %455 = vst [vmem:[%s297_s8] sm:$0x1] %v454_v20  ;;  %v433_v25 = vpop.f32.mrf.mxu0 }
 0x129   : > { %448 = vst [vmem:[%s297_s8 + $0x18] sm:$0xff] %v442_v24  ;;  %v434_v26 = vadd.f32 %v433_v25, %v334_v16 }
 0x12b   : > { %446 = vst [vmem:[%s297_s8 + $0x8] sm:$0xff] %v434_v26 }
 0x12c   : > { %800 = shalt.err (!%p797_p7)
}
 0x12d   : > { %s801_s12 = scalar_lea.hbm %s1061_s10, 512  ;;  %s805_s27 = scalar_lea.hbm %s1114_s5, 1024 }
 0x12e   : > { %p802_p4 = scmp.ne.s32.totalorder %s1061_s10, %s801_s12  ;;  %p806_p11 = scmp.lt.s32.totalorder %s1061_s10, %s1114_s5 }
 0x12f   : > { %p807_p12 = scmp.lt.s32.totalorder %s805_s27, %s801_s12 }
 0x130   : > { %p803_p6 = pnand %p802_p4, %p1000_p13 }
 0x131   : > { %p808_p1 = por %p807_p12, %p806_p11 }
 0x132   : > { %p804_p9 = pneg %p803_p6 }
 0x134   : > { %p809_p8 = pnand %p808_p1, %p804_p9 }
 0x136   : > { %812 = shalt.err (!%p809_p8)
}
 0x137   : > { %s878_s8 = smov 128   ;;  %s879_s16 = smov 8  }
 0x138   : > { %652 = dma.vmem_to_hbm [thread:$0]  (%p1000_p13), %s1056_s11, 512, %s1061_s10, %s457_s1, %s878_s8, %s878_s8, %s879_s16  }
 0x139 PF: > { %s487_s9 = sand.u32 1, %s851_s18   ;;  %p1134_p10 = scmp.ne.s32.totalorder %s1123_s29, 0 }
 0x13a   : > { %p1135_p0 = scmp.ge.s32.totalorder %s871_s23, 2  ;;  %s488_s6 = scalar_lea.sflag [#allocation4], %s487_s9 }
 0x13c   : > { %p663_p2 = pnand %p1135_p0, %p1134_p10 }
 0x13e   : > { %p664_p3 = pneg %p663_p2 }
 0x140   : > { %846 = dma.done.wait (%p664_p3), %s488_s6, 512  }
 0x141   : > { %848 = vsyncadd (%p664_p3), %s488_s6, 4294966784  ;;  %s22_s23 = sadd.s32 1, %s871_s23   ;;  %s1136_s17 = sld [smem:[#allocation11_spill]] }
 0x142   : > { %p19_p5 = scmp.ge.s32.totalorder %s22_s23, 4   ;;  %s1137_s18 = smov %s855_s19 }
 0x143   : > { %s1138_s19 = smov %s859_s20  ;;  %s1139_s20 = smov %s1009_s7 }
 0x144   : > { %s1140_s21 = smov %s867_s22  ;;  %21 = sbr.rel (!%p19_p5) target bundleno = 9 (0x9), region = 99 }
 0x147   : > { %s1141_s22 = smov %s1136_s17 }
 0x149   :  { %493 = vsyncpa [#allocation3], 1 }
 0x14a   :  { %495 = vsyncpa [#allocation3 + $0x1], 1 }
 0x14b   :  { %496 = vsyncpa [#allocation6], 1 }
 0x14c   :  { %497 = vsyncpa [#allocation4], 1 }
 0x14d   :  { %499 = vsyncpa [#allocation4 + $0x1], 1 }

// kernel: tpu_custom_call.1
= control target key start
LH: loop header
LB: loop body
LE: loop exit
PB: predicated region body
PF: predicated region fallthrough
CT: control target
= control target key end

     0   :  { %s1109_s0 = inlined_call_operand.hbm [shape: bf16[2,32,128], index: 0, kind: input, shape index: {}]   ;;  %s1110_s1 = inlined_call_operand.hbm [shape: bf16[128,128], index: 1, kind: input, shape index: {}]   ;;  %s1111_s2 = inlined_call_operand.vmem [shape: f32[1,128], index: 2, kind: input, shape index: {}]   ;;  %s1112_s3 = inlined_call_operand.vmem [shape: f32[2,1,128], index: 3, kind: input, shape index: {}]   ;;  %s1113_s4 = inlined_call_operand.vmem [shape: f32[2,1,128], index: 4, kind: input, shape index: {}]   ;;  %s1114_s5 = inlined_call_operand.hbm [shape: f32[2,32,128], index: 5, kind: output, shape index: {}]  }
   0x1   :  { %1119 = sst [smem:[#allocation12_spill]] %s1110_s1 }
   0x2   :  { %10 = vsyncpa [#allocation3], 0 }
   0x3   :  { %12 = vsyncpa [#allocation3 + $0x1], 0 }
   0x4   :  { %13 = vsyncpa [#allocation6], 0 }
   0x5   :  { %14 = vsyncpa [#allocation4], 0 }
   0x6   :  { %16 = vsyncpa [#allocation4 + $0x1], 0  ;;  %s910_s18 = smov 0   ;;  %s912_s19 = smov 0  }
   0x7   :  { %s914_s20 = smov 0   ;;  %s916_s21 = smov 0  }
   0x8   :  { %s918_s22 = smov 0   ;;  %s920_s23 = smov 0  }
   0x9 LB: > { %s587_s24 = sadd.s32 4294967295, %s871_s23   ;;  %s588_s25 = sadd.s32 4294967294, %s871_s23   ;;  %s871_s23 = sphi %s920_s23, %s22_s23   ;;  %s867_s22 = sphi %s918_s22, %s1141_s22   ;;  %s863_s21 = sphi %s916_s21, %s1140_s21   ;;  %s859_s20 = sphi %s914_s20, %s1139_s20   ;;  %s855_s19 = sphi %s912_s19, %s1138_s19   ;;  %s851_s18 = sphi %s910_s18, %s1137_s18  }
   0xa   : > { %p56_p0 = scmp.ne.s32.totalorder %s855_s19, %s851_s18  ;;  %p944_p1 = scmp.eq.s32.totalorder %s587_s24, 0 }
   0xb   : > { %p948_p2 = scmp.eq.s32.totalorder %s587_s24, 1  ;;  %p182_p3 = scmp.eq.s32.totalorder %s588_s25, 1 }
   0xc   : > { %p954_p4 = por %p944_p1, %p56_p0  ;;  %p589_p5 = scmp.ge.s32.totalorder %s871_s23, 1 }
   0xd   : > { %p959_p6 = por %p182_p3, %p56_p0  ;;  %p189_p7 = scmp.lt.s32.totalorder %s871_s23, 3 }
   0xe   : > { %s1122_s28 = scalar_select %p954_p4, 1, 0 }
   0xf   : > { %s1123_s29 = scalar_select %p959_p6, 1, 0 }
  0x10   : > { %p964_p8 = pnand %p589_p5, %p189_p7  ;;  %s873_s6 = smov [#allocation5]  }
  0x11   : > { %s201_s7 = sshll.u32 %s873_s6, 4  ;;  %s34_s9 = sadd.s32 1, %s867_s22  ;;  %s202_s7 = int_to_ptr.vmem [resolvable:$true] %s201_s7 }
  0x12   : > { %p654_p9 = pneg %p964_p8  ;;  %s744_s10 = scalar_lea.vmem %s202_s7, 1024 }
  0x13   : > { %p745_p13 = scmp.ne.s32.totalorder %s202_s7, %s744_s10  ;;  %p752_p5 = scmp.lt.s32.totalorder %s202_s7, %s202_s7 }
  0x14   : > { %p973_p11 = pnand %p654_p9, %p944_p1  ;;  %p753_p7 = scmp.lt.s32.totalorder %s744_s10, %s744_s10 }
  0x16   : > { %p735_p12 = pneg %p973_p11  ;;  %p754_p6 = por %p753_p7, %p752_p5 }
  0x18   : > { %p747_p0 = pnand %p745_p13, %p735_p12 }
  0x1a   : > { %p748_p3 = pneg %p747_p0 }
  0x1c   : > { %p755_p4 = pnand %p754_p6, %p748_p3 }
  0x1e   : > { %758 = shalt.err (!%p755_p4)
}
  0x1f   : > { %s1116_s11 = smov 64   ;;  %s1117_s12 = smov 4  }
  0x20   : > { %s1126_s1 = sld [smem:[#allocation12_spill]]  ;;  %p36_p4 = scmp.ge.s32.totalorder %s34_s9, 2 }
  0x21   : > { %s43_s15 = sadd.s32 1, %s859_s20  ;;  %p50_p6 = scmp.ne.s32.totalorder %s859_s20, %s855_s19 }
  0x22   : > { %p51_p9 = scmp.eq.s32.totalorder %s871_s23, 0  ;;  %s1143_s9 = smov (%p36_p4, %s34_s9), 0 }
  0x23   : > { %1127 = sst [smem:[#allocation11_spill]] %s1143_s9  ;;  %p1000_p13 = por %p948_p2, %p50_p6 }
  0x24   : > { %p994_p12 = por %p51_p9, %p50_p6  ;;  %s38_s24 = ssub.s32 %s867_s22, %s1143_s9 }
  0x25   : > { %p667_p0 = scmp.lt.s32.totalorder %s871_s23, 2  ;;  %s218_s25 = sand.u32 1, %s859_s20  }
  0x26   : > { %657 = dma.hbm_to_vmem [thread:$0]  (!%p973_p11), %s1126_s1, 1024, %s202_s7, [#allocation6], %s1116_s11, %s1116_s11, %s1117_s12  }
  0x27   : > { %p41_p11 = scmp.eq.s32.totalorder %s38_s24, 0  ;;  %s592_s6 = sshll.u32 %s218_s25, 4 }
  0x28   : > { %s614_s8 = sshll.u32 %s867_s22, 8  ;;  %s222_s11 = scalar_lea.vmem [#allocation2], %s592_s6 }
  0x29   : > { %s1009_s7 = scalar_select %p41_p11, %s859_s20, %s43_s15  }
  0x2a   : > { %s230_s14 = scalar_lea.hbm %s1109_s0, %s614_s8  ;;  %s231_s12 = sshll.u32 %s222_s11, 4  ;;  %s232_s12 = int_to_ptr.vmem [resolvable:$true] %s231_s12 }
  0x2b   : > { %p1017_p2 = pnand %p667_p0, %p994_p12  ;;  %s219_s1 = scalar_lea.sflag [#allocation3], %s218_s25 }
  0x2c   : > { %s772_s24 = scalar_lea.vmem %s232_s12, 256  ;;  %s876_s15 = smov [#allocation2]  }
  0x2d   : > { %p761_p3 = pneg %p1017_p2  ;;  %p773_p5 = scmp.ne.s32.totalorder %s232_s12, %s772_s24 }
  0x2e   : > { %s777_s9 = sshll.u32 %s876_s15, 4  ;;  %s778_s9 = int_to_ptr.vmem [resolvable:$false] %s777_s9 }
  0x2f   : > { %p775_p7 = pnand %p773_p5, %p761_p3  ;;  %s779_s8 = scalar_lea.vmem %s778_s9, 512 }
  0x30   : > { %p780_p6 = scmp.lt.s32.totalorder %s232_s12, %s778_s9  ;;  %p781_p9 = scmp.lt.s32.totalorder %s779_s8, %s772_s24 }
  0x31   : > { %p776_p4 = pneg %p775_p7 }
  0x32   : > { %p782_p11 = por %p781_p9, %p780_p6 }
  0x34   : > { %p783_p10 = pnand %p782_p11, %p776_p4 }
  0x36   : > { %786 = shalt.err (!%p783_p10)
}
  0x37   : > { %s1131_s11 = smov 4   ;;  %s1132_s16 = smov 64  }
  0x38   : > { %661 = dma.hbm_to_vmem [thread:$0]  (!%p1017_p2), %s230_s14, 256, %s232_s12, %s219_s1, %s1132_s16, %s1132_s16, %s1131_s11  }
  0x39   : > { %255 = sbr.rel (%p964_p8) target bundleno = 313 (0x139), region = 40  ;;  %s1031_s25 = sand.u32 (!%p964_p8), 1, %s855_s19  }
  0x3a   : > { %s596_s9 = sshll.u32 (!%p964_p8), %s1031_s25, 4  ;;  %s258_s6 = scalar_lea.sflag (!%p964_p8), [#allocation3], %s1031_s25 }
  0x3b   : > { %s261_s10 = scalar_lea.vmem (!%p964_p8), [#allocation2], %s596_s9  ;;  %p1133_p12 = scmp.ne.s32.totalorder (!%p964_p8), %s1122_s28, 0 }
  0x3e   : > { %838 = dma.done.wait (%p1133_p12), %s258_s6, 256  }
  0x3f   : > { %840 = vsyncadd (%p1133_p12), %s258_s6, 4294967040 }
  0x40   : > { %842 = dma.done.wait (%p944_p1), [#allocation6], 1024  }
  0x41   : > { %844 = vsyncadd (%p944_p1), [#allocation6], 4294966272  ;;  %v723_v0 = vld [vmem:[#allocation5 + $0x38] sm:$0xff]   ;;  %v724_v1 = vld [vmem:[#allocation5 + $0x30] sm:$0xff]   ;;  %p299_p1 = scmp.lt.s32.totalorder %s863_s21, 1  ;;  %v331_v10 = vlaneseq  ;;  %s598_s15 = sshll.u32 %s1031_s25, 5 }
  0x42   : > { %626 = vmatprep.subr.bf16.mxu0 %v723_v0  ;;  %v725_v2 = vld [vmem:[#allocation5 + $0x28] sm:$0xff]   ;;  %v726_v3 = vld [vmem:[#allocation5 + $0x20] sm:$0xff]   ;;  %v727_v5 = vld [vmem:[#allocation5 + $0x18] sm:$0xff]   ;;  %s297_s8 = scalar_lea.vmem [#allocation7], %s598_s15  ;;  %s615_s16 = sshll.u32 %s863_s21, 9 }
  0x43   : > { %627 = vmatpush3.bf16.msra.mxu0 %v723_v0  ;;  %v731_v4 = vld [vmem:[%s261_s10] sm:$0xff]   ;;  %v729_v7 = vld [vmem:[#allocation5 + $0x8] sm:$0xff]   ;;  %s300_s1 = scalar_select %p299_p1, %s863_s21, 1  ;;  %v332_v11 = vshrl.u32 %v331_v10, 7 }
  0x44   : > { %628 = vmatprep.subr.bf16.mxu0 %v724_v1  ;;  %642 = vmatprep.mubr.bf16.mxu0 %v731_v4  ;;  %v728_v6 = vld [vmem:[#allocation5 + $0x10] sm:$0xff]   ;;  %v730_v8 = vld [vmem:[#allocation5] sm:$0xff]   ;;  %v732_v9 = vld [vmem:[%s261_s10 + $0x8] sm:$0xff]   ;;  %s472_s11 = sshll.u32 %s297_s8, 4  ;;  %s1061_s10 = scalar_lea.hbm %s1114_s5, %s615_s16  ;;  %s1056_s11 = int_to_ptr.vmem [resolvable:$true] %s472_s11 }
  0x45   : > { %s304_s30 = scalar_lea.vmem %s1113_s4, %s300_s1  ;;  %v308_v13 = vld [vmem:[%s1111_s2] sm:$0x1]  ;;  %v333_v15 = vsub.s32 0, %v332_v11  ;;  %s301_s24 = scalar_lea.vmem %s1112_s3, %s300_s1 }
  0x46   : > { %v307_v12 = vld [vmem:[%s304_s30] sm:$0x1]  ;;  %s457_s1 = scalar_lea.sflag [#allocation4], %s1031_s25  ;;  %s787_s21 = scalar_lea.vmem %s1056_s11, 512 }
  0x47   : > { %629 = vmatpush3.bf16.msra.mxu0 %v724_v1  ;;  %v309_v14 = vadd.f32 %v308_v13, %v307_v12  ;;  %v453_v17 = vld [vmem:[%s301_s24] sm:$0x1]  ;;  %p788_p8 = scmp.ne.s32.totalorder %s1056_s11, %s787_s21  ;;  %s877_s26 = smov [#allocation7]  }
  0x48   : > { %630 = vmatprep.subr.bf16.mxu0 %v725_v2  ;;  %v454_v20 = vadd.f32 %v453_v17, %v307_v12  ;;  %s791_s28 = sshll.u32 %s877_s26, 4  ;;  %s792_s28 = int_to_ptr.vmem [resolvable:$false] %s791_s28 }
  0x49   : > { %v334_v16 = vrot.slane %v309_v14, %v333_v15  ;;  %p789_p10 = pnand %p788_p8, %p1000_p13  ;;  %s793_s30 = scalar_lea.vmem %s792_s28, 1024 }
  0x4a   : > { %p794_p2 = scmp.lt.s32.totalorder %s1056_s11, %s792_s28  ;;  %p795_p3 = scmp.lt.s32.totalorder %s793_s30, %s787_s21 }
  0x4b   : > { %631 = vmatpush3.bf16.msra.mxu0 %v725_v2  ;;  %p790_p0 = pneg %p789_p10 }
  0x4c   : > { %632 = vmatprep.subr.bf16.mxu0 %v726_v3  ;;  %p796_p5 = por %p795_p3, %p794_p2 }
  0x4e   : > { %p797_p7 = pnand %p796_p5, %p790_p0 }
  0x4f   : > { %633 = vmatpush3.bf16.msra.mxu0 %v726_v3 }
  0x50   : > { %634 = vmatprep.subr.bf16.mxu0 %v727_v5 }
  0x53   : > { %635 = vmatpush3.bf16.msra.mxu0 %v727_v5 }
  0x54   : > { %636 = vmatprep.subr.bf16.mxu0 %v728_v6 }
  0x57   : > { %637 = vmatpush3.bf16.msra.mxu0 %v728_v6 }
  0x58   : > { %638 = vmatprep.subr.bf16.mxu0 %v729_v7 }
  0x5b   : > { %639 = vmatpush3.bf16.msra.mxu0 %v729_v7 }
  0x5c   : > { %640 = vmatprep.subr.bf16.mxu0 %v730_v8 }
  0x5f   : > { %641 = vmatpush3.bf16.msra.mxu0 %v730_v8 }
  0x62   : > { %643 = vmatmul.mubr.bf16.vlgmr.msra.gmra.mxu0 %v732_v9 }
 0x122   : > { %v644_v18 = vpop.f32.mrf.mxu0 }
 0x123   : > { %v439_v19 = vadd.f32 %v644_v18, %v334_v16 }
 0x124   : > { %v430_v21 = vpop.f32.mrf.mxu0 }
 0x125   : > { %447 = vst [vmem:[%s297_s8 + $0x10] sm:$0xff] %v439_v19  ;;  %v431_v22 = vadd.f32 %v430_v21, %v334_v16 }
 0x126   : > { %v645_v23 = vpop.f32.mrf.mxu0 }
 0x127   : > { %445 = vst [vmem:[%s297_s8] sm:$0xff] %v431_v22  ;;  %v442_v24 = vadd.f32 %v645_v23, %v334_v16 }
 0x128   : > { %455 = vst [vmem:[%s297_s8] sm:$0x1] %v454_v20  ;;  %v433_v25 = vpop.f32.mrf.mxu0 }
 0x129   : > { %448 = vst [vmem:[%s297_s8 + $0x18] sm:$0xff] %v442_v24  ;;  %v434_v26 = vadd.f32 %v433_v25, %v334_v16 }
 0x12b   : > { %446 = vst [vmem:[%s297_s8 + $0x8] sm:$0xff] %v434_v26 }
 0x12c   : > { %800 = shalt.err (!%p797_p7)
}
 0x12d   : > { %s801_s12 = scalar_lea.hbm %s1061_s10, 512  ;;  %s805_s27 = scalar_lea.hbm %s1114_s5, 1024 }
 0x12e   : > { %p802_p4 = scmp.ne.s32.totalorder %s1061_s10, %s801_s12  ;;  %p806_p11 = scmp.lt.s32.totalorder %s1061_s10, %s1114_s5 }
 0x12f   : > { %p807_p12 = scmp.lt.s32.totalorder %s805_s27, %s801_s12 }
 0x130   : > { %p803_p6 = pnand %p802_p4, %p1000_p13 }
 0x131   : > { %p808_p1 = por %p807_p12, %p806_p11 }
 0x132   : > { %p804_p9 = pneg %p803_p6 }
 0x134   : > { %p809_p8 = pnand %p808_p1, %p804_p9 }
 0x136   : > { %812 = shalt.err (!%p809_p8)
}
 0x137   : > { %s878_s8 = smov 128   ;;  %s879_s16 = smov 8  }
 0x138   : > { %652 = dma.vmem_to_hbm [thread:$0]  (%p1000_p13), %s1056_s11, 512, %s1061_s10, %s457_s1, %s878_s8, %s878_s8, %s879_s16  }
 0x139 PF: > { %s487_s9 = sand.u32 1, %s851_s18   ;;  %p1134_p10 = scmp.ne.s32.totalorder %s1123_s29, 0 }
 0x13a   : > { %p1135_p0 = scmp.ge.s32.totalorder %s871_s23, 2  ;;  %s488_s6 = scalar_lea.sflag [#allocation4], %s487_s9 }
 0x13c   : > { %p663_p2 = pnand %p1135_p0, %p1134_p10 }
 0x13e   : > { %p664_p3 = pneg %p663_p2 }
 0x140   : > { %846 = dma.done.wait (%p664_p3), %s488_s6, 512  }
 0x141   : > { %848 = vsyncadd (%p664_p3), %s488_s6, 4294966784  ;;  %s22_s23 = sadd.s32 1, %s871_s23   ;;  %s1136_s17 = sld [smem:[#allocation11_spill]] }
 0x142   : > { %p19_p5 = scmp.ge.s32.totalorder %s22_s23, 4   ;;  %s1137_s18 = smov %s855_s19 }
 0x143   : > { %s1138_s19 = smov %s859_s20  ;;  %s1139_s20 = smov %s1009_s7 }
 0x144   : > { %s1140_s21 = smov %s867_s22  ;;  %21 = sbr.rel (!%p19_p5) target bundleno = 9 (0x9), region = 99 }
 0x147   : > { %s1141_s22 = smov %s1136_s17 }
 0x149   :  { %493 = vsyncpa [#allocation3], 1 }
 0x14a   :  { %495 = vsyncpa [#allocation3 + $0x1], 1 }
 0x14b   :  { %496 = vsyncpa [#allocation6], 1 }
 0x14c   :  { %497 = vsyncpa [#allocation4], 1 }
 0x14d   :  { %499 = vsyncpa [#allocation4 + $0x1], 1 }

</bundles_post_ra>
